<compile_context>
chip_gen: v5e
topology: v5e:2x2
jax: 0.10.0
libtpu: 0.0.40
codegen_flags: <defaults>
</compile_context>

<pallas_src>
import math
from functools import partial

import jax
import jax.numpy as jnp
from jax.experimental import pallas as pl
from jax.experimental.pallas import tpu as pltpu

F32 = jnp.float32
BF16 = jnp.bfloat16
_SQRT1_2 = 1.0 / math.sqrt(2.0)

# pltpu.roll is expected to follow np.roll semantics; a tiny probe kernel (run once in
# __main__) confirms the convention so the conv tap shifts can never be silently reversed.
_ROLL_MATCHES_NUMPY = True


def _detect_roll_convention():
    global _ROLL_MATCHES_NUMPY

    def k(x_ref, o_ref):
        o_ref[...] = pltpu.roll(x_ref[...], shift=1, axis=1)

    x = jnp.tile(jnp.arange(128, dtype=F32)[None, :], (8, 1))
    y = pl.pallas_call(k, out_shape=jax.ShapeDtypeStruct((8, 128), F32))(x)
    _ROLL_MATCHES_NUMPY = bool(float(y[0, 0]) == 127.0)


# ----------------------------------------------------------------------------
# In-kernel helpers (traced inside kernels)
# ----------------------------------------------------------------------------

def _shifted_taps(x, masks, H, W, K):
    """x: (C, N) VMEM-resident value (N = H*W, row-major tokens).
    Returns K*K arrays (C, N); tap t=(dy,dx) holds x shifted so column n sees token
    (y+dy-p, x+dx-p), zeroed outside the image (== zero 'same' padding)."""
    N = H * W
    p = (K - 1) // 2
    taps = []
    for dy in range(K):
        for dx in range(K):
            oy, ox = dy - p, dx - p
            d = oy * W + ox
            if d == 0:
                piece = x
            else:
                shift = (-d) % N if _ROLL_MATCHES_NUMPY else d % N
                piece = pltpu.roll(x, shift=shift, axis=1)
            if not (oy == 0 and ox == 0):
                t = dy * K + dx
                piece = piece * masks[t:t + 1, :]
            taps.append(piece)
    return taps


# ----------------------------------------------------------------------------
# Pallas kernels (all data channels-first: (C, N), N on lanes)
# ----------------------------------------------------------------------------

def _ln_cf_kernel(x_ref, g_ref, b_ref, o_ref, *, eps):
    x = x_ref[0]                                            # (C, N)
    mu = jnp.mean(x, axis=0, keepdims=True)
    xc = x - mu
    var = jnp.mean(xc * xc, axis=0, keepdims=True)
    o_ref[0] = xc * jax.lax.rsqrt(var + eps) * g_ref[...] + b_ref[...]


def _fc1_dw_gelu_kernel(x_ref, m_ref, w1_ref, b1_ref, wd_ref, bd_ref, o_ref, *, H, W):
    # fc1 (channels-first: W1 @ X), depthwise 3x3 via roll+mask taps, bias, exact GELU.
    h = jnp.dot(w1_ref[...], x_ref[0], preferred_element_type=F32) + b1_ref[...]
    taps = _shifted_taps(h, m_ref[...], H, W, 3)
    acc = jnp.zeros_like(h)
    for t in range(9):
        acc = acc + taps[t] * wd_ref[t]                     # wd_ref[t]: (C, 1)
    acc = acc + bd_ref[...]
    o_ref[0] = 0.5 * acc * (1.0 + jax.lax.erf(acc * _SQRT1_2))


def _fc2_res_ln_kernel(h_ref, res_ref, w2_ref, b2_ref, g_ref, bb_ref, o_ref, *, eps):
    z = res_ref[0] + jnp.dot(w2_ref[...], h_ref[0], preferred_element_type=F32) + b2_ref[...]
    mu = jnp.mean(z, axis=0, keepdims=True)
    zc = z - mu
    var = jnp.mean(zc * zc, axis=0, keepdims=True)
    o_ref[0] = zc * jax.lax.rsqrt(var + eps) * g_ref[...] + bb_ref[...]


def _branch_conv_kernel(x_ref, out1_ref, m_ref, w_ref, b_ref, o_ref, *, H, W, Cout):
    # Fused conv7/conv5/conv3 (+ folded BN) + relu-combine + add token-branch out1.
    taps = _shifted_taps(x_ref[0], m_ref[...], H, W, 7)
    xcol = jnp.concatenate(taps, axis=0).astype(BF16)       # (49*Cin, N)
    y = jnp.dot(w_ref[...], xcol, preferred_element_type=F32) + b_ref[...]   # (3*Cout, N)
    c7 = y[:Cout]
    c5 = y[Cout:2 * Cout]
    c3 = y[2 * Cout:3 * Cout]
    branch = (jnp.maximum(c7 + c3, 0.0) + jnp.maximum(c5 + c3, 0.0)
              + jnp.maximum(c3, 0.0))
    o_ref[0] = out1_ref[0] + branch


def _decoder_conv_kernel(x_ref, m_ref, w_ref, b_ref, o_ref, *, H, W):
    # decoder3 (3x3) + folded dbn3 + ReLU.
    taps = _shifted_taps(x_ref[0], m_ref[...], H, W, 3)
    xcol = jnp.concatenate(taps, axis=0).astype(BF16)       # (9*Cin, N)
    y = jnp.dot(w_ref[...], xcol, preferred_element_type=F32) + b_ref[...]
    o_ref[0] = jnp.maximum(y, 0.0)


# ----------------------------------------------------------------------------
# pallas_call wrapper (grid over batch; all blocks lane-dense along N)
# ----------------------------------------------------------------------------

def _tokcall(kernel, out_channels, batched, replicated, out_dtype=F32):
    B, _, N = batched[0].shape
    in_specs = (
        [pl.BlockSpec((1,) + tuple(a.shape[1:]), lambda b: (b, 0, 0)) for a in batched]
        + [pl.BlockSpec(tuple(a.shape), lambda b, nd=a.ndim: (0,) * nd) for a in replicated]
    )
    return pl.pallas_call(
        kernel,
        out_shape=jax.ShapeDtypeStruct((B, out_channels, N), out_dtype),
        grid=(B,),
        in_specs=in_specs,
        out_specs=pl.BlockSpec((1, out_channels, N), lambda b: (b, 0, 0)),
        compiler_params=pltpu.CompilerParams(dimension_semantics=("parallel",)),
    )(*batched, *replicated)


# ----------------------------------------------------------------------------
# Host-side prep: masks, BN folding, weight packing
# ----------------------------------------------------------------------------

def _make_masks(H, W, K):
    p = (K - 1) // 2
    y = jnp.arange(H)[:, None]
    x = jnp.arange(W)[None, :]
    rows = []
    for dy in range(K):
        for dx in range(K):
            oy, ox = dy - p, dx - p
            valid = (y + oy >= 0) & (y + oy < H) & (x + ox >= 0) & (x + ox < W)
            rows.append(valid.reshape(-1))
    return jnp.stack(rows, axis=0).astype(F32)              # (K*K, H*W)


def _fold_bn(gamma, beta, mean, var, eps=1e-5):
    s = gamma / jnp.sqrt(var + eps)
    return s, beta - mean * s


def _embed_taps(w, k_small, k_big):
    # (Cout, k_small^2, Cin) -> (Cout, k_big^2, Cin), small kernel centered in the big one.
    cout, _, cin = w.shape
    off = (k_big - k_small) // 2
    w4 = w.reshape(cout, k_small, k_small, cin)
    w4 = jnp.pad(w4, ((0, 0), (off, off), (off, off), (0, 0)))
    return w4.reshape(cout, k_big * k_big, cin)


def _prep_branch_weights(p):
    cout, _, cin = p["c7_w"].shape
    w7 = p["c7_w"] * p["c7_s"][:, None, None]
    w5 = _embed_taps(p["c5_w"], 5, 7) * p["c5_s"][:, None, None]
    w3 = _embed_taps(p["c3_w"], 3, 7) * p["c3_s"][:, None, None]
    w_all = jnp.concatenate([w7, w5, w3], axis=0).reshape(3 * cout, 49 * cin).astype(BF16)
    b7 = p["c7_b"] * p["c7_s"] + p["c7_t"]
    b5 = p["c5_b"] * p["c5_s"] + p["c5_t"]
    b3 = p["c3_b"] * p["c3_s"] + p["c3_t"]
    b_all = jnp.concatenate([b7, b5, b3]).reshape(3 * cout, 1)
    return w_all, b_all


def _prep_decoder_weights(p):
    outsize, _, cin = p["dec_w"].shape
    wd = (p["dec_w"] * p["bn3_s"][:, None, None]).reshape(outsize, 9 * cin).astype(BF16)
    bd = (p["dec_b"] * p["bn3_s"] + p["bn3_t"]).reshape(outsize, 1)
    return wd, bd


# ----------------------------------------------------------------------------
# JAX glue (pure data movement -- no heavy compute)
# ----------------------------------------------------------------------------

def upsample_bilinear_2x_align_corners(x):
    # nn.UpsamplingBilinear2d(scale_factor=2) == F.interpolate(..., align_corners=True). NCHW.
    B, C, h, w = x.shape
    H, W = 2 * h, 2 * w
    ys = jnp.arange(H, dtype=F32) * (h - 1) / (H - 1)
    xs = jnp.arange(W, dtype=F32) * (w - 1) / (W - 1)
    y0 = jnp.floor(ys).astype(jnp.int32)
    y1 = jnp.minimum(y0 + 1, h - 1)
    x0 = jnp.floor(xs).astype(jnp.int32)
    x1 = jnp.minimum(x0 + 1, w - 1)
    wy = (ys - y0.astype(F32)).reshape(1, 1, H, 1)
    wx = (xs - x0.astype(F32)).reshape(1, 1, 1, W)

    def g(yi, xi):
        return x[:, :, yi, :][:, :, :, xi]

    top = g(y0, x0) * (1.0 - wx) + g(y0, x1) * wx
    bot = g(y1, x0) * (1.0 - wx) + g(y1, x1) * wx
    return top * (1.0 - wy) + bot * wy


def spatial_shift(x_nchw, axis, shift_size=5):
    # Replicates shiftmlp's pad -> chunk(channels) -> per-chunk roll -> crop.
    pad = shift_size // 2
    B, C, H, W = x_nchw.shape
    xn = jnp.pad(x_nchw, ((0, 0), (0, 0), (pad, pad), (pad, pad)))
    chunk = -(-C // shift_size)                 # torch.chunk: ceil(C / shift_size)
    sizes, rem = [], C
    while rem > 0:
        sizes.append(min(chunk, rem))
        rem -= chunk
    pieces, start = [], 0
    for sz, sh in zip(sizes, range(-pad, pad + 1)):
        pieces.append(jnp.roll(xn[:, start:start + sz], sh, axis=axis))
        start += sz
    xc = jnp.concatenate(pieces, axis=1)
    return xc[:, :, pad:pad + H, pad:pad + W]


# ----------------------------------------------------------------------------
# Full forward pass
# ----------------------------------------------------------------------------

def unet_up_smlp3_forward(inputs1, inputs2, p):
    up2 = upsample_bilinear_2x_align_corners(inputs2)
    outputsor = jnp.concatenate([inputs1, up2], axis=1)     # (B, dim, H, W) NCHW
    B, C, H, W = outputsor.shape
    N = H * W
    outsize = p["dec_w"].shape[0]

    tok = outputsor.reshape(B, C, N)                        # channels-first tokens
    mask3 = _make_masks(H, W, 3)
    mask7 = _make_masks(H, W, 7)
    col = lambda v: v.reshape(-1, 1)

    # --- token branch: shiftedBlock (x + shiftmlp(norm2(x))) then dnorm3 -----------
    xn = _tokcall(partial(_ln_cf_kernel, eps=1e-5), C,
                  [tok], [col(p["norm2_g"]), col(p["norm2_b"])])
    xs = spatial_shift(xn.reshape(B, C, H, W), axis=2).reshape(B, C, N)   # shift along H
    dw9 = p["dw_w"].T[:, :, None]                                        # (9, C, 1)
    h = _tokcall(partial(_fc1_dw_gelu_kernel, H=H, W=W), C,
                 [xs], [mask3, p["fc1_w"], col(p["fc1_b"]), dw9, col(p["dw_b"])])
    hs = spatial_shift(h.reshape(B, C, H, W), axis=3).reshape(B, C, N)    # shift along W
    out1 = _tokcall(partial(_fc2_res_ln_kernel, eps=1e-5), C,
                    [hs, tok], [p["fc2_w"], col(p["fc2_b"]),
                                col(p["dnorm3_g"]), col(p["dnorm3_b"])])

    # --- fused conv7/conv5/conv3 branch (+BN) + relu-combine + add out1 ------------
    w_all, b_all = _prep_branch_weights(p)
    out_sum = _tokcall(partial(_branch_conv_kernel, H=H, W=W, Cout=C), C,
                       [tok, out1], [mask7, w_all, b_all])

    # --- decoder3 (3x3) + dbn3 + ReLU ----------------------------------------------
    w_dec, b_dec = _prep_decoder_weights(p)
    dec = _tokcall(partial(_decoder_conv_kernel, H=H, W=W), outsize,
                   [out_sum], [mask3, w_dec, b_dec])
    return dec.reshape(B, outsize, H, W)                    # NCHW (free reshape)


# ----------------------------------------------------------------------------
# Pure-JAX reference (independent formulation; used for a loose self-check)
# ----------------------------------------------------------------------------

def _reference_forward(inputs1, inputs2, p):
    up2 = upsample_bilinear_2x_align_corners(inputs2)
    x = jnp.concatenate([inputs1, up2], axis=1)
    B, C, H, W = x.shape
    N = H * W
    tok = x.reshape(B, C, N).transpose(0, 2, 1)             # (B, N, C)

    def ln(t, g, b, eps=1e-5):
        mu = jnp.mean(t, axis=-1, keepdims=True)
        v = jnp.mean((t - mu) ** 2, axis=-1, keepdims=True)
        return (t - mu) * jax.lax.rsqrt(v + eps) * g + b

    y = ln(tok, p["norm2_g"], p["norm2_b"])
    y = spatial_shift(y.transpose(0, 2, 1).reshape(B, C, H, W), axis=2)
    y = y.reshape(B, C, N).transpose(0, 2, 1)
    h = y @ p["fc1_w"].T + p["fc1_b"]
    hh = h.transpose(0, 2, 1).reshape(B, C, H, W)
    hp = jnp.pad(hh, ((0, 0), (0, 0), (1, 1), (1, 1)))
    dw = jnp.zeros_like(hh)
    for dy in range(3):
        for dx in range(3):
            dw = dw + hp[:, :, dy:dy + H, dx:dx + W] * p["dw_w"][None, :, dy * 3 + dx, None, None]
    dw = dw + p["dw_b"][None, :, None, None]
    act = 0.5 * dw * (1.0 + jax.lax.erf(dw * _SQRT1_2))
    g2 = spatial_shift(act, axis=3).reshape(B, C, N).transpose(0, 2, 1)
    mlp = g2 @ p["fc2_w"].T + p["fc2_b"]
    out1 = ln(tok + mlp, p["dnorm3_g"], p["dnorm3_b"])
    out1 = out1.transpose(0, 2, 1).reshape(B, C, H, W)

    def convbn(inp, w, bias, s, t, K):
        cout, _, cin = w.shape
        wf = (w * s[:, None, None]).astype(BF16).astype(F32)          # mimic bf16 weights
        oihw = wf.transpose(0, 2, 1).reshape(cout, cin, K, K)
        y = jax.lax.conv_general_dilated(
            inp, oihw, (1, 1), ((K // 2, K // 2), (K // 2, K // 2)),
            dimension_numbers=("NCHW", "OIHW", "NCHW"))
        return y + (bias * s + t)[None, :, None, None]

    c7 = convbn(x, p["c7_w"], p["c7_b"], p["c7_s"], p["c7_t"], 7)
    c5 = convbn(x, p["c5_w"], p["c5_b"], p["c5_s"], p["c5_t"], 5)
    c3 = convbn(x, p["c3_w"], p["c3_b"], p["c3_s"], p["c3_t"], 3)
    out = (out1 + jnp.maximum(c7 + c3, 0.0) + jnp.maximum(c5 + c3, 0.0)
           + jnp.maximum(c3, 0.0))
    dec = convbn(out, p["dec_w"], p["dec_b"], p["bn3_s"], p["bn3_t"], 3)
    return jnp.maximum(dec, 0.0)


# ----------------------------------------------------------------------------
# Deterministic synthetic parameters
# ----------------------------------------------------------------------------

def init_params(key, dim, outsize):
    ks = jax.random.split(key, 24)
    nrm = lambda k, shape, std=0.02: std * jax.random.normal(k, shape, F32)
    ones = lambda n: jnp.ones((n,), F32)
    zeros = lambda n: jnp.zeros((n,), F32)

    def bn(kg, kb, n):
        gamma = 1.0 + 0.1 * jax.random.normal(kg, (n,), F32)
        beta = 0.05 * jax.random.normal(kb, (n,), F32)
        return _fold_bn(gamma, beta, zeros(n), ones(n))     # eval mode: mean=0, var=1

    c7_s, c7_t = bn(ks[0], ks[1], dim)
    c5_s, c5_t = bn(ks[2], ks[3], dim)
    c3_s, c3_t = bn(ks[4], ks[5], dim)
    bn3_s, bn3_t = bn(ks[6], ks[7], outsize)

    return {
        # shiftedBlock / shiftmlp (hidden == dim because mlp_ratio = 1)
        "norm2_g": ones(dim), "norm2_b": zeros(dim),
        "fc1_w": nrm(ks[8], (dim, dim)), "fc1_b": nrm(ks[9], (dim,)),
        "dw_w": nrm(ks[10], (dim, 9), std=math.sqrt(2.0 / 9.0)), "dw_b": nrm(ks[11], (dim,)),
        "fc2_w": nrm(ks[12], (dim, dim)), "fc2_b": nrm(ks[13], (dim,)),
        "dnorm3_g": ones(dim), "dnorm3_b": zeros(dim),
        # conv7 / conv5 / conv3 (+ BatchNorm2d eval mode).  Weight layout (Cout, K*K, Cin)
        # with tap t = dy*K + dx  (== PyTorch (Cout, Cin, K, K).transpose(0, 2, 3, 1) flat).
        "c7_w": nrm(ks[14], (dim, 49, dim), std=math.sqrt(2.0 / (49 * dim))),
        "c7_b": nrm(ks[15], (dim,)), "c7_s": c7_s, "c7_t": c7_t,
        "c5_w": nrm(ks[16], (dim, 25, dim), std=math.sqrt(2.0 / (25 * dim))),
        "c5_b": nrm(ks[17], (dim,)), "c5_s": c5_s, "c5_t": c5_t,
        "c3_w": nrm(ks[18], (dim, 9, dim), std=math.sqrt(2.0 / (9 * dim))),
        "c3_b": nrm(ks[19], (dim,)), "c3_s": c3_s, "c3_t": c3_t,
        # decoder3 (3x3, dim -> outsize) + dbn3
        "dec_w": nrm(ks[20], (outsize, 9, dim), std=math.sqrt(2.0 / (9 * dim))),
        "dec_b": nrm(ks[21], (outsize,)), "bn3_s": bn3_s, "bn3_t": bn3_t,
    }


if __name__ == "__main__":
    B, C1, C2, H, W = 2, 4, 4, 16, 16
    dim = C1 + C2          # channel count after the concat feeding the block / convs
    outsize = 4

    key = jax.random.PRNGKey(0)
    k1, k2, kp = jax.random.split(key, 3)
    inputs1 = jax.random.normal(k1, (B, C1, H, W), F32)
    inputs2 = jax.random.normal(k2, (B, C2, H // 2, W // 2), F32)
    params = init_params(kp, dim, outsize)

    _detect_roll_convention()

    out = jax.block_until_ready(jax.jit(unet_up_smlp3_forward)(inputs1, inputs2, params))
    assert out.shape == (B, outsize, H, W), out.shape
    assert bool(jnp.all(jnp.isfinite(out)))

    # Loose self-check against a plain-JAX reference (tolerance covers bf16 conv operands).
    ref = jax.block_until_ready(_reference_forward(inputs1, inputs2, params))
    err = float(jnp.max(jnp.abs(out - ref)))
    tol = 5e-2 * max(1.0, float(jnp.max(jnp.abs(ref))))
    assert err < tol, f"mismatch vs reference: max abs err = {err} (tol {tol})"

    print("KERNEL_OK")
</pallas_src>

<mosaic_0001>
module attributes {stable_mosaic.version = 11 : i64} {
  func.func @k(%arg0: memref<8x128xf32, #tpu.memory_space<vmem>>, %arg1: memref<8x128xf32, #tpu.memory_space<vmem>>) attributes {dimension_semantics = [], scalar_prefetch = 0 : i64, scratch_operands = 0 : i64, tpu.core_type = #tpu.core_type<tc>} {
    %c0 = arith.constant 0 : index
    %c0_0 = arith.constant 0 : index
    %0 = vector.load %arg0[%c0, %c0_0] : memref<8x128xf32, #tpu.memory_space<vmem>>, vector<8x128xf32>
    %c1_i32 = arith.constant 1 : i32
    %1 = tpu.dynamic_rotate %0 by %c1_i32 dim 1 : vector<8x128xf32>, i32 -> vector<8x128xf32>
    %c0_1 = arith.constant 0 : index
    %c0_2 = arith.constant 0 : index
    %2 = vector.load %arg1[%c0_1, %c0_2] : memref<8x128xf32, #tpu.memory_space<vmem>>, vector<8x128xf32>
    tpu.vector_store %arg1[%c0_1, %c0_2], %1 {strides = array<i32>} : memref<8x128xf32, #tpu.memory_space<vmem>>, vector<8x128xf32>,
    return
  }
}

</mosaic_0001>

<bundles_post_ra>
// kernel: tpu_custom_call.1
= control target key start
LH: loop header
LB: loop body
LE: loop exit
PB: predicated region body
PF: predicated region fallthrough
CT: control target
= control target key end

     0   :  { %6 = vsyncpa [#allocation3], 0  ;;  %s118_s0 = inlined_call_operand.hbm [shape: f32[8,128], index: 0, kind: input, shape index: {}]   ;;  %s119_s1 = inlined_call_operand.hbm [shape: f32[8,128], index: 1, kind: output, shape index: {}]  }
   0x1   :  { %7 = vsyncpa [#allocation4], 0  ;;  %s13_s8 = sshll.u32 %s118_s0, 4  ;;  %s99_s9 = smov [#allocation2]   ;;  %s14_s8 = int_to_ptr.hbm [resolvable:$true] %s13_s8 }
   0x2   :  { %s15_s10 = sshll.u32 %s99_s9, 4  ;;  %s16_s10 = int_to_ptr.vmem [resolvable:$true] %s15_s10 }
   0x3   :  { %18 = dma.hbm_to_vmem [thread:$0]  %s14_s8, 128, %s16_s10, [#allocation3]  }
   0x4   :  { %95 = dma.done.wait [#allocation3], 128  }
   0x5   :  { %96 = vsyncadd [#allocation3], 4294967168  ;;  %v23_v0 = vld [vmem:[#allocation2] sm:$0xff]  ;;  %s100_s11 = smov 1   ;;  %s101_s12 = smov [#allocation5]  }
   0x6   :  { %24 = vrot.lane.b32.xlu0 %v23_v0, %s100_s11  ;;  %s32_s13 = sshll.u32 %s101_s12, 4  ;;  %s34_s16 = sshll.u32 %s119_s1, 4  ;;  %s33_s13 = int_to_ptr.vmem [resolvable:$true] %s32_s13  ;;  %s35_s16 = int_to_ptr.hbm [resolvable:$true] %s34_s16 }
  0x78   :  { %v25_v1 = vpop.permute.xlu0 %24 }
  0x79   :  { %26 = vst [vmem:[#allocation5] sm:$0xff] %v25_v1 }
  0x7a   :  { %37 = dma.vmem_to_hbm [thread:$0]  %s33_s13, 128, %s35_s16, [#allocation4]  }
  0x7b   :  { %97 = dma.done.wait [#allocation4], 128  }
  0x7c   :  { %98 = vsyncadd [#allocation4], 4294967168 }
  0x7d   :  { %42 = vsyncpa [#allocation3], 1 }
  0x7e   :  { %43 = vsyncpa [#allocation4], 1 }

</bundles_post_ra>
